<compile_context>
chip_gen: v6e
topology: v6e:2x2x1
jax: 0.10.0
libtpu: 0.0.40
codegen_flags: <defaults>
</compile_context>

<pallas_src>
import functools

import jax
import jax.numpy as jnp
from jax import lax
from jax.experimental import pallas as pl
from jax.experimental.pallas import tpu as pltpu

_NEG_INF = -1e30  # finite "masked" value: avoids (-inf)-(-inf)=NaN under tiling


# --------------------------------------------------------------------------
# Kernels
# --------------------------------------------------------------------------
def _qkv_proj_kernel(x_ref, w_ref, q_ref, k_ref, v_ref, *, d_model):
    """Fused QKV projection: one (ts, D) x (D, 3D) MXU call per grid step.

    w_ref = [Wq^T / sqrt(d_k) | Wk^T | Wv^T], pre-built and pre-cast in the
    wrapper, so the 1/sqrt(d_k) score scale is folded into Q here.
    """
    qkv = jnp.dot(x_ref[0], w_ref[...], preferred_element_type=jnp.float32)
    q_ref[0] = qkv[:, :d_model].astype(q_ref.dtype)
    k_ref[0] = qkv[:, d_model:2 * d_model].astype(k_ref.dtype)
    v_ref[0] = qkv[:, 2 * d_model:].astype(v_ref.dtype)


def _linear_kernel(x_ref, w_ref, o_ref):
    """y = x @ w  (w already transposed / cast in the wrapper)."""
    o_ref[0] = jnp.dot(x_ref[0], w_ref[...],
                       preferred_element_type=jnp.float32).astype(o_ref.dtype)


def _flash_attn_kernel(q_ref, k_ref, v_ref, o_ref,
                       m_scratch, l_scratch, acc_scratch,
                       *, num_heads, d_k, tq, tkv, approx_recip):
    """One grid step (batch b, q-tile qi, kv-tile ki) of causal flash attention.

    q_ref : (1, tq,  D) pre-scaled queries (compute dtype)
    k_ref : (1, tkv, D) keys               (compute dtype)
    v_ref : (1, tkv, D) values             (compute dtype)
    o_ref : (1, tq,  D) concatenated head outputs
    scratch: m, l (H, tq, 1) f32; acc (H, tq, d_k) f32 (online softmax state)
    """
    qi = pl.program_id(1)
    ki = pl.program_id(2)
    nk = pl.num_programs(2)

    # ---- init once per q tile (first kv step) ----
    @pl.when(ki == 0)
    def _init():
        m_scratch[...] = jnp.full_like(m_scratch, _NEG_INF)
        l_scratch[...] = jnp.zeros_like(l_scratch)
        acc_scratch[...] = jnp.zeros_like(acc_scratch)

    q_first = qi * tq
    q_last = q_first + (tq - 1)
    k_first = ki * tkv
    k_last = k_first + (tkv - 1)

    def attend(apply_mask):
        q = q_ref[0]      # (tq, D)   pre-scaled by 1/sqrt(d_k)
        k = k_ref[0]      # (tkv, D)
        v = v_ref[0]      # (tkv, D)
        if apply_mask:
            q_pos = q_first + lax.broadcasted_iota(jnp.int32, (tq, tkv), 0)
            k_pos = k_first + lax.broadcasted_iota(jnp.int32, (tq, tkv), 1)
            bias = jnp.where(q_pos >= k_pos, jnp.float32(0.0),
                             jnp.float32(_NEG_INF))              # (tq, tkv)
        # TODO(synk): lax.fori_loop over heads / head packing for large H or
        # d_k < 128; unrolled loop is fine for the shapes exercised here.
        for h in range(num_heads):
            sl = slice(h * d_k, (h + 1) * d_k)
            # Q @ K^T without transposing values (contract last dims).
            s = lax.dot_general(q[:, sl], k[:, sl],
                                (((1,), (1,)), ((), ())),
                                preferred_element_type=jnp.float32)  # (tq, tkv)
            if apply_mask:
                s = s + bias
            m_prev = m_scratch[h]                                    # (tq, 1)
            m_new = jnp.maximum(m_prev, jnp.max(s, axis=-1, keepdims=True))
            alpha = jnp.exp(m_prev - m_new)                          # (tq, 1)
            p = jnp.exp(s - m_new)                                   # (tq, tkv)
            l_scratch[h] = alpha * l_scratch[h] + jnp.sum(p, axis=-1,
                                                          keepdims=True)
            acc_scratch[h] = alpha * acc_scratch[h] + jnp.dot(
                p.astype(v.dtype), v[:, sl],
                preferred_element_type=jnp.float32)                  # (tq, d_k)
            m_scratch[h] = m_new

    # Strictly below-diagonal tiles: every key valid -> no mask VPU work.
    @pl.when(k_last <= q_first)
    def _below_diagonal():
        attend(apply_mask=False)

    # Diagonal-crossing tiles: additive causal bias.
    @pl.when(jnp.logical_and(k_first <= q_last, k_last > q_first))
    def _crossing_diagonal():
        attend(apply_mask=True)

    # Fully above-diagonal tiles: no compute; their K/V DMA is also elided by
    # the clamped index_map set up in the wrapper.

    # ---- finalize (last kv step): normalize and merge heads ----
    @pl.when(ki == nk - 1)
    def _finalize():
        outs = []
        for h in range(num_heads):
            inv_l = pl.reciprocal(l_scratch[h], approx=approx_recip)  # (tq, 1)
            outs.append(acc_scratch[h] * inv_l)                       # (tq, d_k)
        o_ref[0] = jnp.concatenate(outs, axis=-1).astype(o_ref.dtype)


# --------------------------------------------------------------------------
# Wrapper
# --------------------------------------------------------------------------
def _pick_tile(size, target, multiple):
    """Largest tile <= target dividing `size` with sublane multiple `multiple`;
    falls back to the full axis (full-dim blocks are always legal)."""
    if size <= target:
        return size
    for t in range(min(target, size), multiple - 1, -1):
        if size % t == 0 and t % multiple == 0:
            return t
    return size


def _vmem_limit_bytes():
    """Generation-aware VMEM limit with headroom for compiler scratch."""
    phys = 64 * 1024 * 1024          # assume smallest (v7x per-TensorCore)
    try:
        phys = int(pltpu.get_tpu_info().vmem_capacity_bytes)
    except Exception:
        pass
    return (phys * 7) // 8           # ~12.5% headroom


def causal_multihead_self_attention(x, wq, wk, wv, wo, num_heads,
                                    token_positions=None, *,
                                    q_block=256, kv_block=256,
                                    compute_dtype=jnp.bfloat16):
    """x: (B, S, d_model). Weights in PyTorch nn.Linear layout (out, in).

    q_block/kv_block: 256 matches v6e/v7x's 256-wide MXU; pass 128 on v5e.
    compute_dtype: bf16 (default, production) -> bf16 MXU inputs with f32
    accumulation; pass jnp.float32 for bit-tight numerics.
    """
    # TODO(synk): RoPE branch not implemented (theta=None configuration).
    del token_positions
    B, S, D = x.shape
    assert D % num_heads == 0, "d_model must be divisible by num_heads"
    d_k = D // num_heads
    cdt = jnp.dtype(compute_dtype)
    out_dtype = x.dtype

    # Sublane (second-to-last block dim) multiple: 8 for f32, 16 for bf16.
    sub_mult = 8 * (4 // cdt.itemsize)
    tq = _pick_tile(S, q_block, sub_mult)
    tkv = _pick_tile(S, kv_block, sub_mult)
    ts = _pick_tile(S, 256, sub_mult)          # seq tile for the projection GEMMs

    vmem_limit = _vmem_limit_bytes()
    scale = 1.0 / (d_k ** 0.5)

    # One-time HBM-side prep: transpose to x @ W layout, fold the 1/sqrt(d_k)
    # score scale into Wq, fuse the Q/K/V weights, and cast everything
    # (including x) to the compute dtype so the kernels never cast per step.
    w_qkv = jnp.concatenate([wq.T * scale, wk.T, wv.T], axis=1).astype(cdt)  # (D, 3D)
    wo_t = wo.T.astype(cdt)                                                  # (D, D)
    x_c = x.astype(cdt)

    # ---- 1) fused QKV projection: x -> q (pre-scaled), k, v ----------------
    q, k, v = pl.pallas_call(
        functools.partial(_qkv_proj_kernel, d_model=D),
        out_shape=(jax.ShapeDtypeStruct((B, S, D), cdt),) * 3,
        grid=(B, S // ts),
        in_specs=[
            pl.BlockSpec((1, ts, D), lambda b, si: (b, si, 0)),
            pl.BlockSpec((D, 3 * D), lambda b, si: (0, 0)),
        ],
        out_specs=tuple(pl.BlockSpec((1, ts, D), lambda b, si: (b, si, 0))
                        for _ in range(3)),
        compiler_params=pltpu.CompilerParams(
            dimension_semantics=("parallel", "parallel"),
            vmem_limit_bytes=vmem_limit),
    )(x_c, w_qkv)

    # ---- 2) flash causal attention over the projected q/k/v ----------------
    def kv_index_map(b, qi, ki):
        # Clamp to the last kv tile this q tile can attend to so fully-masked
        # steps re-reference the resident block and Pallas elides the DMA.
        last_needed = (qi * tq + (tq - 1)) // tkv
        return (b, jnp.minimum(ki, last_needed), 0)

    attn_kernel = functools.partial(
        _flash_attn_kernel, num_heads=num_heads, d_k=d_k, tq=tq, tkv=tkv,
        approx_recip=(cdt != jnp.dtype(jnp.float32)))

    attn = pl.pallas_call(
        attn_kernel,
        out_shape=jax.ShapeDtypeStruct((B, S, D), cdt),
        grid=(B, S // tq, S // tkv),
        in_specs=[
            pl.BlockSpec((1, tq, D), lambda b, qi, ki: (b, qi, 0)),   # Q (scaled)
            pl.BlockSpec((1, tkv, D), kv_index_map),                  # K
            pl.BlockSpec((1, tkv, D), kv_index_map),                  # V
        ],
        out_specs=pl.BlockSpec((1, tq, D), lambda b, qi, ki: (b, qi, 0)),
        scratch_shapes=[
            pltpu.VMEM((num_heads, tq, 1), jnp.float32),     # running max m
            pltpu.VMEM((num_heads, tq, 1), jnp.float32),     # running sum l
            pltpu.VMEM((num_heads, tq, d_k), jnp.float32),   # running output acc
        ],
        compiler_params=pltpu.CompilerParams(
            dimension_semantics=("parallel", "parallel", "arbitrary"),
            vmem_limit_bytes=vmem_limit),
    )(q, k, v)

    # ---- 3) output projection: attn @ Wo^T -> (B, S, D) in x.dtype ---------
    out = pl.pallas_call(
        _linear_kernel,
        out_shape=jax.ShapeDtypeStruct((B, S, D), out_dtype),
        grid=(B, S // ts),
        in_specs=[
            pl.BlockSpec((1, ts, D), lambda b, si: (b, si, 0)),
            pl.BlockSpec((D, D), lambda b, si: (0, 0)),
        ],
        out_specs=pl.BlockSpec((1, ts, D), lambda b, si: (b, si, 0)),
        compiler_params=pltpu.CompilerParams(
            dimension_semantics=("parallel", "parallel"),
            vmem_limit_bytes=vmem_limit),
    )(attn, wo_t)

    return out


# --------------------------------------------------------------------------
# Pure-JAX reference & self-test
# --------------------------------------------------------------------------
def _reference(x, wq, wk, wv, wo, num_heads):
    """Pure-JAX reference mirroring the PyTorch forward exactly."""
    B, S, D = x.shape
    d_k = D // num_heads

    def proj(w):
        y = jnp.einsum('bsd,ed->bse', x, w)                  # Linear: x @ W.T
        return y.reshape(B, S, num_heads, d_k).transpose(0, 2, 1, 3)

    q, k, v = proj(wq), proj(wk), proj(wv)
    scores = jnp.einsum('bhqd,bhkd->bhqk', q, k) / (d_k ** 0.5)
    mask = jnp.tril(jnp.ones((S, S), dtype=bool))
    scores = jnp.where(mask[None, None], scores, -jnp.inf)
    attn = jax.nn.softmax(scores, axis=-1)
    out = jnp.einsum('bhqk,bhkd->bhqd', attn, v)
    out = out.transpose(0, 2, 1, 3).reshape(B, S, D)
    return jnp.einsum('bsd,ed->bse', out, wo)


def _run_case(key, B, S, d_model, num_heads, *, compute_dtype,
              q_block, kv_block, atol, rtol):
    kx, kq, kk, kv, ko = jax.random.split(key, 5)
    x = jax.random.normal(kx, (B, S, d_model), dtype=jnp.float32)
    # Deterministic weight init, PyTorch Linear convention (out, in), no bias.
    wq = jax.random.normal(kq, (d_model, d_model), dtype=jnp.float32) * 0.02
    wk = jax.random.normal(kk, (d_model, d_model), dtype=jnp.float32) * 0.02
    wv = jax.random.normal(kv, (d_model, d_model), dtype=jnp.float32) * 0.02
    wo = jax.random.normal(ko, (d_model, d_model), dtype=jnp.float32) * 0.02
    token_positions = jnp.arange(S)[None, :].repeat(B, axis=0)  # unused (no RoPE)

    out = causal_multihead_self_attention(
        x, wq, wk, wv, wo, num_heads, token_positions,
        q_block=q_block, kv_block=kv_block, compute_dtype=compute_dtype)
    out = jax.block_until_ready(out)
    ref = _reference(x, wq, wk, wv, wo, num_heads)
    assert out.shape == (B, S, d_model)
    assert out.dtype == x.dtype
    max_err = jnp.max(jnp.abs(out - ref))
    assert jnp.allclose(out, ref, atol=atol, rtol=rtol), (
        f"mismatch vs JAX reference (B={B}, S={S}, d_model={d_model}, "
        f"compute_dtype={compute_dtype}, max_abs_err={max_err})")


if __name__ == "__main__":
    key = jax.random.PRNGKey(0)
    k1, k2, k3 = jax.random.split(key, 3)
    # Small single-tile case (grid = (2,1,1)), exact f32 path.
    _run_case(k1, B=2, S=8, d_model=32, num_heads=4,
              compute_dtype=jnp.float32, q_block=128, kv_block=128,
              atol=2e-5, rtol=2e-5)
    # Multi-tile f32: online softmax across kv tiles, causal tile skipping and
    # DMA-elided masked kv fetches; grid = (2, 2, 2).
    _run_case(k2, B=2, S=256, d_model=64, num_heads=4,
              compute_dtype=jnp.float32, q_block=128, kv_block=128,
              atol=3e-5, rtol=3e-5)
    # Production path: bf16 operands (cast once in the wrapper), f32 accum,
    # tq != tkv; grid = (2, 2, 4).
    _run_case(k3, B=2, S=256, d_model=64, num_heads=4,
              compute_dtype=jnp.bfloat16, q_block=128, kv_block=64,
              atol=2e-2, rtol=2e-2)
    print("KERNEL_OK")
</pallas_src>

<mosaic_0001>
module attributes {stable_mosaic.version = 11 : i64} {
  func.func @_qkv_proj_kernel(%arg0: i32, %arg1: i32, %arg2: memref<1x8x32xf32, #tpu.memory_space<vmem>>, %arg3: memref<32x96xf32, #tpu.memory_space<vmem>>, %arg4: memref<1x8x32xf32, #tpu.memory_space<vmem>>, %arg5: memref<1x8x32xf32, #tpu.memory_space<vmem>>, %arg6: memref<1x8x32xf32, #tpu.memory_space<vmem>>) attributes {dimension_semantics = [#tpu.dimension_semantics<parallel>, #tpu.dimension_semantics<parallel>], iteration_bounds = array<i64: 2, 1>, scalar_prefetch = 0 : i64, scratch_operands = 0 : i64, tpu.core_type = #tpu.core_type<tc>, window_params = [{transform_indices = @transform_0, window_bounds = array<i64: 1, 8, 32>}, {pipeline_mode = #tpu.pipeline_mode<synchronous>, transform_indices = @transform_1, window_bounds = array<i64: 32, 96>}, {transform_indices = @transform_2, window_bounds = array<i64: 1, 8, 32>}, {transform_indices = @transform_3, window_bounds = array<i64: 1, 8, 32>}, {transform_indices = @transform_4, window_bounds = array<i64: 1, 8, 32>}]} {
    %c0 = arith.constant 0 : index
    %c0_0 = arith.constant 0 : index
    %c0_1 = arith.constant 0 : index
    %0 = vector.load %arg2[%c0, %c0_0, %c0_1] : memref<1x8x32xf32, #tpu.memory_space<vmem>>, vector<1x8x32xf32>
    %1 = vector.shape_cast %0 : vector<1x8x32xf32> to vector<8x32xf32>
    %c0_2 = arith.constant 0 : index
    %c0_3 = arith.constant 0 : index
    %2 = vector.load %arg3[%c0_2, %c0_3] : memref<32x96xf32, #tpu.memory_space<vmem>>, vector<32x96xf32>
    %cst = arith.constant dense<0.000000e+00> : vector<8x96xf32>
    %3 = tpu.matmul %1, %2, %cst {dimension_numbers = #tpu.dot_dimension_numbers<[1], [0], [0], [1], [0, 0, 1, 1], [], []>} : vector<8x32xf32>, vector<32x96xf32>, vector<8x96xf32> -> vector<8x96xf32>
    %4 = vector.extract_strided_slice %3 {offsets = [0, 0], sizes = [8, 32], strides = [1, 1]} : vector<8x96xf32> to vector<8x32xf32>
    %c0_4 = arith.constant 0 : index
    %c0_5 = arith.constant 0 : index
    %c0_6 = arith.constant 0 : index
    %5 = vector.load %arg4[%c0_4, %c0_5, %c0_6] : memref<1x8x32xf32, #tpu.memory_space<vmem>>, vector<1x8x32xf32>
    %6 = vector.shape_cast %5 : vector<1x8x32xf32> to vector<8x32xf32>
    %7 = vector.shape_cast %4 : vector<8x32xf32> to vector<1x8x32xf32>
    tpu.vector_store %arg4[%c0_4, %c0_5, %c0_6], %7 {strides = array<i32>} : memref<1x8x32xf32, #tpu.memory_space<vmem>>, vector<1x8x32xf32>,
    %8 = vector.extract_strided_slice %3 {offsets = [0, 32], sizes = [8, 32], strides = [1, 1]} : vector<8x96xf32> to vector<8x32xf32>
    %c0_7 = arith.constant 0 : index
    %c0_8 = arith.constant 0 : index
    %c0_9 = arith.constant 0 : index
    %9 = vector.load %arg5[%c0_7, %c0_8, %c0_9] : memref<1x8x32xf32, #tpu.memory_space<vmem>>, vector<1x8x32xf32>
    %10 = vector.shape_cast %9 : vector<1x8x32xf32> to vector<8x32xf32>
    %11 = vector.shape_cast %8 : vector<8x32xf32> to vector<1x8x32xf32>
    tpu.vector_store %arg5[%c0_7, %c0_8, %c0_9], %11 {strides = array<i32>} : memref<1x8x32xf32, #tpu.memory_space<vmem>>, vector<1x8x32xf32>,
    %12 = vector.extract_strided_slice %3 {offsets = [0, 64], sizes = [8, 32], strides = [1, 1]} : vector<8x96xf32> to vector<8x32xf32>
    %c0_10 = arith.constant 0 : index
    %c0_11 = arith.constant 0 : index
    %c0_12 = arith.constant 0 : index
    %13 = vector.load %arg6[%c0_10, %c0_11, %c0_12] : memref<1x8x32xf32, #tpu.memory_space<vmem>>, vector<1x8x32xf32>
    %14 = vector.shape_cast %13 : vector<1x8x32xf32> to vector<8x32xf32>
    %15 = vector.shape_cast %12 : vector<8x32xf32> to vector<1x8x32xf32>
    tpu.vector_store %arg6[%c0_10, %c0_11, %c0_12], %15 {strides = array<i32>} : memref<1x8x32xf32, #tpu.memory_space<vmem>>, vector<1x8x32xf32>,
    return
  }
  func.func @transform_0(%arg0: i32, %arg1: i32) -> (i32, i32, i32) {
    %c0_i32 = arith.constant 0 : i32
    %c0_i32_0 = arith.constant 0 : i32
    return %arg0, %arg1, %c0_i32 : i32, i32, i32
  }
  func.func @transform_1(%arg0: i32, %arg1: i32) -> (i32, i32) {
    %c0_i32 = arith.constant 0 : i32
    %c0_i32_0 = arith.constant 0 : i32
    %c0_i32_1 = arith.constant 0 : i32
    return %c0_i32, %c0_i32_0 : i32, i32
  }
  func.func @transform_2(%arg0: i32, %arg1: i32) -> (i32, i32, i32) {
    %c0_i32 = arith.constant 0 : i32
    %c0_i32_0 = arith.constant 0 : i32
    return %arg0, %arg1, %c0_i32 : i32, i32, i32
  }
  func.func @transform_3(%arg0: i32, %arg1: i32) -> (i32, i32, i32) {
    %c0_i32 = arith.constant 0 : i32
    %c0_i32_0 = arith.constant 0 : i32
    return %arg0, %arg1, %c0_i32 : i32, i32, i32
  }
  func.func @transform_4(%arg0: i32, %arg1: i32) -> (i32, i32, i32) {
    %c0_i32 = arith.constant 0 : i32
    %c0_i32_0 = arith.constant 0 : i32
    return %arg0, %arg1, %c0_i32 : i32, i32, i32
  }
}

</mosaic_0001>

<bundles_post_ra>
// kernel: tpu_custom_call.1
= control target key start
LH: loop header
LB: loop body
LE: loop exit
PB: predicated region body
PF: predicated region fallthrough
CT: control target
= control target key end

     0   :  { %s1166_s0 = inlined_call_operand.hbm [shape: f32[2,8,32], index: 0, kind: input, shape index: {}]   ;;  %s1167_s1 = inlined_call_operand.hbm [shape: f32[32,96], index: 1, kind: input, shape index: {}]   ;;  %s1168_s2 = inlined_call_operand.hbm [shape: f32[2,8,32], index: 2, kind: output, shape index: {0}]   ;;  %s1169_s3 = inlined_call_operand.hbm [shape: f32[2,8,32], index: 3, kind: output, shape index: {1}]   ;;  %s1170_s4 = inlined_call_operand.hbm [shape: f32[2,8,32], index: 4, kind: output, shape index: {2}]  }
   0x1   :  { %1173 = sst [smem:[#allocation15_spill]] %s1167_s1 }
   0x2   :  { %10 = vsyncpa [#allocation3], 0 }
   0x3   :  { %12 = vsyncpa [#allocation3 + $0x1], 0 }
   0x4   :  { %13 = vsyncpa [#allocation6], 0 }
   0x5   :  { %14 = vsyncpa [#allocation4], 0 }
   0x6   :  { %16 = vsyncpa [#allocation4 + $0x1], 0 }
   0x7   :  { %17 = vsyncpa [#allocation9], 0 }
   0x8   :  { %19 = vsyncpa [#allocation9 + $0x1], 0  ;;  %s921_s15 = smov 0   ;;  %s923_s16 = smov 0  }
   0x9   :  { %s925_s17 = smov 0   ;;  %s927_s18 = smov 0  }
   0xa   :  { %s929_s19 = smov 0   ;;  %s931_s20 = smov 0  }
   0xb LB: > { %s952_s21 = sadd.s32 4294967295, %s883_s20   ;;  %s1171_s22 = sadd.s32 4294967294, %s883_s20   ;;  %s883_s20 = sphi %s931_s20, %s25_s20   ;;  %s879_s19 = sphi %s929_s19, %s1192_s19   ;;  %s875_s18 = sphi %s927_s18, %s1191_s18   ;;  %s871_s17 = sphi %s925_s17, %s1190_s17   ;;  %s867_s16 = sphi %s923_s16, %s1189_s16   ;;  %s863_s15 = sphi %s921_s15, %s1188_s15  }
   0xc   : > { %p59_p0 = scmp.ne.s32.totalorder %s867_s16, %s863_s15  ;;  %p1172_p1 = scmp.eq.s32.totalorder %s952_s21, 0 }
   0xd   : > { %p112_p3 = scmp.eq.s32.totalorder %s1171_s22, 1  ;;  %p564_p5 = scmp.ge.s32.totalorder %s883_s20, 1 }
   0xe   : > { %p963_p4 = por %p1172_p1, %p59_p0  ;;  %p175_p7 = scmp.lt.s32.totalorder %s883_s20, 3 }
   0xf   : > { %p968_p6 = por %p112_p3, %p59_p0  ;;  %s885_s26 = smov [#allocation5]  }
  0x10   : > { %p973_p8 = pnand %p564_p5, %p175_p7  ;;  %s187_s27 = sshll.u32 %s885_s26, 4  ;;  %s188_s27 = int_to_ptr.vmem [resolvable:$true] %s187_s27 }
  0x11   : > { %s1175_s24 = scalar_select %p968_p6, 1, 0 }
  0x12   : > { %p612_p9 = pneg %p973_p8  ;;  %s37_s29 = sadd.s32 1, %s879_s19 }
  0x13   : > { %s700_s30 = scalar_lea.vmem %s188_s27, 512  ;;  %p708_p5 = scmp.lt.s32.totalorder %s188_s27, %s188_s27 }
  0x14   : > { %p982_p11 = pnand %p612_p9, %p1172_p1  ;;  %p701_p13 = scmp.ne.s32.totalorder %s188_s27, %s700_s30 }
  0x15   : > { %p709_p7 = scmp.lt.s32.totalorder %s700_s30, %s700_s30 }
  0x16   : > { %p691_p12 = pneg %p982_p11 }
  0x17   : > { %p710_p2 = por %p709_p7, %p708_p5 }
  0x18   : > { %p703_p0 = pnand %p701_p13, %p691_p12 }
  0x1a   : > { %p704_p3 = pneg %p703_p0 }
  0x1c   : > { %p711_p6 = pnand %p710_p2, %p704_p3 }
  0x1e   : > { %714 = shalt.err (!%p711_p6)
}
  0x1f   : > { %s886_s5 = smov 128   ;;  %s887_s6 = smov 8  }
  0x20   : > { %s1178_s1 = sld [smem:[#allocation15_spill]]  ;;  %p39_p2 = scmp.ge.s32.totalorder %s37_s29, 2 }
  0x21   : > { %s46_s9 = sadd.s32 1, %s871_s17  ;;  %p53_p6 = scmp.ne.s32.totalorder %s871_s17, %s867_s16 }
  0x22   : > { %p54_p9 = scmp.eq.s32.totalorder %s883_s20, 0  ;;  %s1194_s29 = smov (%p39_p2, %s37_s29), 0 }
  0x23   : > { %p1180_p13 = scmp.eq.s32.totalorder %s952_s21, 1  ;;  %s41_s12 = ssub.s32 %s879_s19, %s1194_s29 }
  0x24   : > { %p1000_p12 = por %p54_p9, %p53_p6  ;;  %p631_p3 = scmp.lt.s32.totalorder %s883_s20, 2 }
  0x25   : > { %p1006_p0 = por %p1180_p13, %p53_p6  ;;  %s201_s13 = sand.u32 1, %s871_s17  }
  0x26   : > { %615 = dma.hbm_to_vmem [thread:$0]  (!%p982_p11), %s1178_s1, 512, %s188_s27, [#allocation6], %s886_s5, %s886_s5, %s887_s6  }
  0x27   : > { %p44_p11 = scmp.eq.s32.totalorder %s41_s12, 0  ;;  %s567_s14 = sshll.u32 %s201_s13, 3 }
  0x28   : > { %s568_s27 = sshll.u32 %s879_s19, 7  ;;  %s205_s6 = scalar_lea.vmem [#allocation2], %s567_s14 }
  0x29   : > { %s1015_s26 = scalar_select %p44_p11, %s871_s17, %s46_s9  }
  0x2a   : > { %s211_s5 = scalar_lea.hbm %s1166_s0, %s568_s27  ;;  %s213_s7 = sshll.u32 %s205_s6, 4  ;;  %s214_s7 = int_to_ptr.vmem [resolvable:$true] %s213_s7 }
  0x2b   : > { %p1023_p5 = pnand %p631_p3, %p1000_p12  ;;  %s202_s22 = scalar_lea.sflag [#allocation3], %s201_s13 }
  0x2c   : > { %s728_s12 = scalar_lea.vmem %s214_s7, 128  ;;  %s888_s9 = smov [#allocation2]  }
  0x2d   : > { %p717_p7 = pneg %p1023_p5  ;;  %p729_p2 = scmp.ne.s32.totalorder %s214_s7, %s728_s12 }
  0x2e   : > { %s733_s1 = sshll.u32 %s888_s9, 4  ;;  %s734_s1 = int_to_ptr.vmem [resolvable:$false] %s733_s1 }
  0x2f   : > { %p731_p6 = pnand %p729_p2, %p717_p7  ;;  %s735_s27 = scalar_lea.vmem %s734_s1, 256 }
  0x30   : > { %p736_p13 = scmp.lt.s32.totalorder %s214_s7, %s734_s1  ;;  %p737_p11 = scmp.lt.s32.totalorder %s735_s27, %s728_s12 }
  0x31   : > { %p732_p9 = pneg %p731_p6 }
  0x32   : > { %p738_p10 = por %p737_p11, %p736_p13 }
  0x34   : > { %p739_p1 = pnand %p738_p10, %p732_p9 }
  0x36   : > { %742 = shalt.err (!%p739_p1)
}
  0x37   : > { %619 = dma.hbm_to_vmem [thread:$0]  (!%p1023_p5), %s211_s5, 128, %s214_s7, %s202_s22  }
  0x38   : > { %222 = sbr.rel (%p973_p8) target bundleno = 417 (0x1a1), region = 28  ;;  %s1034_s10 = sand.u32 (!%p973_p8), 1, %s867_s16  }
  0x39   : > { %s1037_s13 = sshll.u32 (!%p973_p8), %s1034_s10, 3  ;;  %s225_s1 = scalar_lea.sflag (!%p973_p8), [#allocation3], %s1034_s10 }
  0x3a   : > { %s228_s14 = scalar_lea.vmem (!%p973_p8), [#allocation2], %s1037_s13 }
  0x3d   : > { %846 = dma.done.wait (%p963_p4), %s225_s1, 128  }
  0x3e   : > { %848 = vsyncadd (%p963_p4), %s225_s1, 4294967168  ;;  %p1183_p1 = scmp.eq.s32.totalorder %s952_s21, 0 }
  0x40   : > { %850 = dma.done.wait (%p1183_p1), [#allocation6], 512   ;;  %p1184_p8 = pmov %p1183_p1 }
  0x41   : > { %v889_v0 = vmov 0.0   ;;  %vm890_vm0 = vmmov 0   ;;  %v271_v1 = vld [vmem:[#allocation5 + $0x18] sm:$0xff]  ;;  %v270_v2 = vld [vmem:[#allocation5 + $0x10] sm:$0xff]  ;;  %v269_v3 = vld [vmem:[#allocation5 + $0x8] sm:$0xff]  ;;  %vm272_vm1 = vcmask 261120  }
  0x42   : > { %852 = vsyncadd (%p1184_p8), [#allocation6], 4294966784  ;;  %589 = vmatprep.subr.mxu0 %v889_v0  ;;  %597 = vmatprep.mubr.msk.f32.mxu0 %vm890_vm0, %v889_v0  ;;  %v268_v4 = vld [vmem:[#allocation5] sm:$0xff]  ;;  %v267_v5 = vld [vmem:[%s228_s14] sm:$0xff]  ;;  %s1051_s22 = sshll.u32 %s875_s18, 7  ;;  %s252_s23 = scalar_lea.vmem [#allocation7], %s1037_s13 }
  0x43   : > { %590 = vmatpush3.msra.mxu0 %v271_v1  ;;  %s381_s25 = sshll.u32 %s252_s23, 4  ;;  %s1058_s5 = scalar_lea.hbm %s1168_s2, %s1051_s22  ;;  %s1060_s25 = int_to_ptr.vmem [resolvable:$true] %s381_s25 }
  0x44   : > { %591 = vmatprep.subr.mxu0 %v889_v0  ;;  %s891_s6 = smov 96   ;;  %s357_s18 = scalar_lea.sflag [#allocation4], %s1034_s10 }
  0x45   : > { %592 = vmatpush3.msra.mxu0 %v270_v2  ;;  %s743_s7 = scalar_lea.vmem %s1060_s25, 128  ;;  %s892_s8 = smov [#allocation7]  }
  0x46   : > { %593 = vmatprep.subr.mxu0 %v889_v0  ;;  %p744_p4 = scmp.ne.s32.totalorder %s1060_s25, %s743_s7  ;;  %s747_s12 = sshll.u32 %s892_s8, 4  ;;  %s748_s12 = int_to_ptr.vmem [resolvable:$false] %s747_s12 }
  0x47   : > { %594 = vmatpush3.msra.mxu0 %v269_v3  ;;  %s749_s9 = scalar_lea.vmem %s748_s12, 256  ;;  %p750_p3 = scmp.lt.s32.totalorder %s1060_s25, %s748_s12 }
  0x48   : > { %595 = vmatprep.subr.mxu0 %v889_v0  ;;  %p745_p10 = pnand %p744_p4, %p1006_p0  ;;  %p751_p5 = scmp.lt.s32.totalorder %s749_s9, %s743_s7 }
  0x49   : > { %596 = vmatpush3.msra.mxu0 %v268_v4 }
  0x4a   : > { %598 = vmatmul.mubr.msk.f32.vlgmr.msra.gmra.mxu0 %vm272_vm1, %v267_v5  ;;  %p746_p12 = pneg %p745_p10  ;;  %p752_p7 = por %p751_p5, %p750_p3 }
  0x4c   : > { %p753_p2 = pnand %p752_p7, %p746_p12 }
 0x10a   : > { %v342_v6 = vpop.f32.mrf.mxu0 }
 0x10b   : > { %346 = vst.msk [vmem:[%s252_s23] sm:$0xff] %vm272_vm1, %v342_v6  ;;  %348 = vrot.lane.b32.xlu0 %v342_v6, %s891_s6 }
 0x10c   : > { %v599_v7 = vpop.f32.mrf.mxu0 }
 0x10d   : > { %756 = shalt.err (!%p753_p2)
}
 0x10e   : > { %s757_s27 = scalar_lea.hbm %s1058_s5, 128  ;;  %s761_s14 = scalar_lea.hbm %s1168_s2, 256 }
 0x10f   : > { %p758_p6 = scmp.ne.s32.totalorder %s1058_s5, %s757_s27  ;;  %p762_p11 = scmp.lt.s32.totalorder %s1058_s5, %s1168_s2 }
 0x110   : > { %p763_p1 = scmp.lt.s32.totalorder %s761_s14, %s757_s27 }
 0x111   : > { %p759_p9 = pnand %p758_p6, %p1006_p0 }
 0x112   : > { %p764_p8 = por %p763_p1, %p762_p11 }
 0x113   : > { %p760_p13 = pneg %p759_p9 }
 0x115   : > { %p765_p4 = pnand %p764_p8, %p760_p13 }
 0x117   : > { %768 = shalt.err (!%p765_p4)
}
 0x118   : > { %606 = dma.vmem_to_hbm [thread:$0]  (%p1006_p0), %s1060_s25, 128, %s1058_s5, %s357_s18  }
 0x119   : > { %s893_s30 = smov 64   ;;  %s361_s6 = sand.u32 1, %s952_s21  }
 0x11a   : > { %352 = vrot.lane.b32.xlu0 %v342_v6, %s893_s30  ;;  %s259_s7 = scalar_lea.vmem [#allocation8], %s1037_s13  ;;  %s1090_s27 = scalar_lea.hbm %s1169_s3, %s1051_s22 }
 0x11b   : > { %s395_s8 = sshll.u32 %s259_s7, 4  ;;  %s266_s10 = scalar_lea.vmem [#allocation10], %s1037_s13  ;;  %s1092_s8 = int_to_ptr.vmem [resolvable:$true] %s395_s8 }
 0x11c   : > { %s409_s1 = sshll.u32 %s266_s10, 4  ;;  %s1098_s25 = scalar_lea.sflag [#allocation9], %s361_s6  ;;  %s410_s1 = int_to_ptr.vmem [resolvable:$true] %s409_s1 }
 0x11d   : > { %s769_s21 = scalar_lea.vmem %s1092_s8, 128  ;;  %s894_s5 = smov [#allocation8]  }
 0x11e   : > { %p770_p10 = scmp.ne.s32.totalorder %s1092_s8, %s769_s21  ;;  %s773_s18 = sshll.u32 %s894_s5, 4  ;;  %s774_s18 = int_to_ptr.vmem [resolvable:$false] %s773_s18 }
 0x11f   : > { %s775_s14 = scalar_lea.vmem %s774_s18, 256  ;;  %p776_p5 = scmp.lt.s32.totalorder %s1092_s8, %s774_s18 }
 0x120   : > { %p771_p12 = pnand %p770_p10, %p1006_p0  ;;  %p777_p7 = scmp.lt.s32.totalorder %s775_s14, %s769_s21 }
 0x122   : > { %p772_p3 = pneg %p771_p12  ;;  %p778_p2 = por %p777_p7, %p776_p5 }
 0x124   : > { %p779_p6 = pnand %p778_p2, %p772_p3 }
 0x17d   : > { %v349_v8 = vpop.permute.xlu0 %348 }
 0x17e   : > { %351 = vst.msk [vmem:[%s259_s7] sm:$0xff] %vm272_vm1, %v349_v8 }
 0x17f   : > { %782 = shalt.err (!%p779_p6)
}
 0x180   : > { %s783_s23 = scalar_lea.hbm %s1090_s27, 128  ;;  %s787_s6 = scalar_lea.hbm %s1169_s3, 256 }
 0x181   : > { %p784_p9 = scmp.ne.s32.totalorder %s1090_s27, %s783_s23  ;;  %p788_p1 = scmp.lt.s32.totalorder %s1090_s27, %s1169_s3 }
 0x182   : > { %p789_p8 = scmp.lt.s32.totalorder %s787_s6, %s783_s23 }
 0x183   : > { %p785_p13 = pnand %p784_p9, %p1006_p0 }
 0x184   : > { %p790_p4 = por %p789_p8, %p788_p1 }
 0x185   : > { %p786_p11 = pneg %p785_p13 }
 0x187   : > { %p791_p10 = pnand %p790_p4, %p786_p11 }
 0x189   : > { %794 = shalt.err (!%p791_p10)
}
 0x18a   : > { %607 = dma.vmem_to_hbm [thread:$0]  (%p1006_p0), %s1092_s8, 128, %s1090_s27, %s1098_s25  }
 0x18b   : > { %s407_s5 = scalar_lea.hbm %s1170_s4, %s1051_s22  ;;  %s795_s18 = scalar_lea.vmem %s410_s1, 128 }
 0x18c   : > { %v353_v9 = vpop.permute.xlu0 %352  ;;  %p796_p12 = scmp.ne.s32.totalorder %s410_s1, %s795_s18  ;;  %s895_s14 = smov [#allocation10]  }
 0x18d   : > { %355 = vst.msk [vmem:[%s266_s10] sm:$0xff] %vm272_vm1, %v353_v9  ;;  %s799_s23 = sshll.u32 %s895_s14, 4  ;;  %s800_s23 = int_to_ptr.vmem [resolvable:$false] %s799_s23 }
 0x18e   : > { %p797_p3 = pnand %p796_p12, %p1006_p0  ;;  %s801_s28 = scalar_lea.vmem %s800_s23, 256 }
 0x18f   : > { %p802_p7 = scmp.lt.s32.totalorder %s410_s1, %s800_s23  ;;  %p803_p2 = scmp.lt.s32.totalorder %s801_s28, %s795_s18 }
 0x190   : > { %p798_p5 = pneg %p797_p3 }
 0x191   : > { %p804_p6 = por %p803_p2, %p802_p7 }
 0x193   : > { %p805_p9 = pnand %p804_p6, %p798_p5 }
 0x195   : > { %808 = shalt.err (!%p805_p9)
}
 0x196   : > { %s809_s22 = scalar_lea.hbm %s407_s5, 128  ;;  %s813_s27 = scalar_lea.hbm %s1170_s4, 256 }
 0x197   : > { %p810_p13 = scmp.ne.s32.totalorder %s407_s5, %s809_s22  ;;  %p814_p8 = scmp.lt.s32.totalorder %s407_s5, %s1170_s4 }
 0x198   : > { %p815_p4 = scmp.lt.s32.totalorder %s813_s27, %s809_s22 }
 0x199   : > { %p811_p11 = pnand %p810_p13, %p1006_p0 }
 0x19a   : > { %p816_p10 = por %p815_p4, %p814_p8 }
 0x19b   : > { %p812_p1 = pneg %p811_p11 }
 0x19d   : > { %p817_p12 = pnand %p816_p10, %p812_p1 }
 0x19f   : > { %820 = shalt.err (!%p817_p12)
}
 0x1a0   : > { %608 = dma.vmem_to_hbm [thread:$0]  (%p1006_p0), %s410_s1, 128, %s407_s5, %s1098_s25  }
 0x1a1 PF: > { %s421_s6 = sand.u32 1, %s863_s15   ;;  %p1185_p3 = scmp.ne.s32.totalorder %s1175_s24, 0 }
 0x1a2   : > { %p1186_p5 = scmp.ge.s32.totalorder %s883_s20, 2  ;;  %s422_s7 = scalar_lea.sflag [#allocation4], %s421_s6 }
 0x1a4   : > { %p621_p7 = pnand %p1186_p5, %p1185_p3 }
 0x1a6   : > { %p622_p2 = pneg %p621_p7 }
 0x1a8   : > { %854 = dma.done.wait (%p622_p2), %s422_s7, 128  }
 0x1a9   : > { %856 = vsyncadd (%p622_p2), %s422_s7, 4294967168  ;;  %s1187_s12 = sadd.s32 4294967294, %s883_s20  }
 0x1aa   : > { %s430_s9 = sand.u32 1, %s1187_s12  }
 0x1ab   : > { %s431_s21 = scalar_lea.sflag [#allocation9], %s430_s9 }
 0x1ac   : > { %858 = dma.done.wait (%p622_p2), %s431_s21, 256  }
 0x1ad   : > { %860 = vsyncadd (%p622_p2), %s431_s21, 4294967040  ;;  %s25_s20 = sadd.s32 1, %s883_s20   ;;  %s1188_s15 = smov %s867_s16 }
 0x1ae   : > { %p22_p0 = scmp.ge.s32.totalorder %s25_s20, 4   ;;  %s1189_s16 = smov %s871_s17 }
 0x1af   : > { %s1190_s17 = smov %s1015_s26  ;;  %s1191_s18 = smov %s879_s19 }
 0x1b0   : > { %s1192_s19 = smov %s1194_s29  ;;  %24 = sbr.rel (!%p22_p0) target bundleno = 11 (0xb), region = 109 }
 0x1b5   :  { %445 = vsyncpa [#allocation3], 1 }
 0x1b6   :  { %447 = vsyncpa [#allocation3 + $0x1], 1 }
 0x1b7   :  { %448 = vsyncpa [#allocation6], 1 }
 0x1b8   :  { %449 = vsyncpa [#allocation4], 1 }
 0x1b9   :  { %451 = vsyncpa [#allocation4 + $0x1], 1 }
 0x1ba   :  { %452 = vsyncpa [#allocation9], 1 }
 0x1bb   :  { %454 = vsyncpa [#allocation9 + $0x1], 1 }

</bundles_post_ra>
